<compile_context>
chip_gen: v6e
topology: v6e:2x2x1
jax: 0.10.0
libtpu: 0.0.40
codegen_flags: <defaults>
</compile_context>

<pallas_src>
import functools

import jax
import jax.numpy as jnp
from jax import lax
from jax.experimental import pallas as pl
from jax.experimental.pallas import tpu as pltpu

_LANES = 128
_SUBLANES = 8


def _round_up(x, m):
    return ((x + m - 1) // m) * m


def _sdf_wmse_kernel(x_ref, t_ref, s_ref, o_ref, acc_ref, *,
                     w_scale, w_bias, rows, tile_rows):
    c = pl.program_id(0)            # outer (core-parallel) split
    i = pl.program_id(1)            # inner (reduction) step
    n_inner = pl.num_programs(1)

    # Zero the vreg-shaped accumulator at the start of each outer split.
    @pl.when(i == 0)
    def _():
        acc_ref[...] = jnp.zeros_like(acc_ref)

    x = x_ref[...].astype(jnp.float32)
    t = t_ref[...].astype(jnp.float32)
    s = s_ref[...].astype(jnp.float32)

    w = jax.nn.sigmoid(s) * w_scale + w_bias      # EUP transcendental + VPU mul/add
    d = x - t
    v = w * d * d

    # Row-validity mask: handles a partial last tile and an over-split outer axis
    # (the clamped index_map may replay the last block; its rows mask to zero).
    # jnp.where (not multiply) so any garbage/NaN in out-of-bounds rows is dropped.
    block = c * n_inner + i
    row_ids = lax.broadcasted_iota(jnp.int32, (tile_rows, 1), 0) + block * tile_rows
    v = jnp.where(row_ids < rows, v, 0.0)

    # Pure-VPU partial sums into the (8,128) accumulator -- no per-step XLU reduce.
    acc_ref[...] += jnp.sum(
        v.reshape(tile_rows // _SUBLANES, _SUBLANES, _LANES), axis=0)

    # Final step for this outer split: one cross-lane reduce, emit partial sum.
    @pl.when(i == n_inner - 1)
    def _():
        o_ref[...] = jnp.sum(acc_ref[...]).reshape(1, 1)


def sdf_weighted_mse_loss(inp, target, sdf,
                          max_land_weight=1.0, min_sea_weight=0.5,
                          tile_rows=2048, num_core_splits=2):
    """mean(weights * (inp - target)^2), weights = sigmoid(sdf)*(maxw-minw)+minw."""
    assert inp.shape == target.shape == sdf.shape
    n = int(inp.size)
    count = float(n)

    def _prep(a):
        # Keep f32/bf16 streams in their native width (bf16 halves HBM bytes);
        # everything else is promoted to f32.
        if a.dtype not in (jnp.float32, jnp.bfloat16):
            a = a.astype(jnp.float32)
        a = a.reshape(-1)
        pad = (-n) % _LANES
        if pad:
            # TODO(synk): a <128-element tail forces jnp.pad (full copy); typical
            # image tensors have numel % 128 == 0, so this path is rarely taken.
            a = jnp.pad(a, (0, pad))
        return a.reshape(-1, _LANES)

    x2, t2, s2 = _prep(inp), _prep(target), _prep(sdf)
    rows = x2.shape[0]

    # Sublane alignment: 16 if any stream is 16-bit, else 8.
    sublane = 16 if any(a.dtype == jnp.bfloat16 for a in (x2, t2, s2)) else _SUBLANES

    # Big tile (never silently collapses); clamp to the (aligned) row count.
    tr = max(sublane, min(int(tile_rows), _round_up(rows, sublane)))
    tr = _round_up(tr, sublane)

    n_blocks = pl.cdiv(rows, tr)
    n_par = max(1, min(int(num_core_splits), n_blocks))   # outer parallel splits
    inner = pl.cdiv(n_blocks, n_par)
    last_block = n_blocks - 1

    def in_map(c, i):
        # Clamp so every (c, i) maps to an in-range block; replayed blocks are
        # fully masked out inside the kernel.
        return (jnp.minimum(c * inner + i, last_block), 0)

    kernel = functools.partial(
        _sdf_wmse_kernel,
        w_scale=float(max_land_weight) - float(min_sea_weight),
        w_bias=float(min_sea_weight),
        rows=rows,
        tile_rows=tr,
    )

    partials = pl.pallas_call(
        kernel,
        out_shape=jax.ShapeDtypeStruct((n_par, 1), jnp.float32),
        grid_spec=pltpu.PrefetchScalarGridSpec(
            num_scalar_prefetch=0,
            grid=(n_par, inner),
            in_specs=[pl.BlockSpec((tr, _LANES), in_map) for _ in range(3)],
            out_specs=pl.BlockSpec((1, 1), lambda c, i: (c, 0)),
            scratch_shapes=[pltpu.VMEM((_SUBLANES, _LANES), jnp.float32)],
        ),
        compiler_params=pltpu.CompilerParams(
            dimension_semantics=("parallel", "arbitrary"),
            vmem_limit_bytes=32 * 1024 * 1024,
        ),
    )(x2, t2, s2)

    return jnp.sum(partials) / count


def _reference(inp, target, sdf, max_land_weight=1.0, min_sea_weight=0.5):
    w = jax.nn.sigmoid(sdf) * (max_land_weight - min_sea_weight) + min_sea_weight
    return jnp.mean(w * (inp - target) ** 2)


if __name__ == "__main__":
    key = jax.random.PRNGKey(0)
    k1, k2, k3 = jax.random.split(key, 3)

    # Small NCHW shapes consistent with the module's usage (image + SDF map).
    B, C, H, W = 2, 4, 16, 16
    x = jax.random.normal(k1, (B, C, H, W), dtype=jnp.float32)
    t = jax.random.normal(k2, (B, C, H, W), dtype=jnp.float32)
    sdf = jax.random.normal(k3, (B, C, H, W), dtype=jnp.float32) * 3.0

    loss = sdf_weighted_mse_loss(x, t, sdf, max_land_weight=1.0, min_sea_weight=0.5)
    loss = jax.block_until_ready(loss)

    ref = _reference(x, t, sdf)
    assert jnp.allclose(loss, ref, rtol=1e-5, atol=1e-6), (loss, ref)
    print("KERNEL_OK")
</pallas_src>

<mosaic_0001>
module attributes {stable_mosaic.version = 11 : i64} {
  func.func @_sdf_wmse_kernel(%arg0: i32, %arg1: i32, %arg2: memref<16x128xf32, #tpu.memory_space<vmem>>, %arg3: memref<16x128xf32, #tpu.memory_space<vmem>>, %arg4: memref<16x128xf32, #tpu.memory_space<vmem>>, %arg5: memref<1x1xf32, #tpu.memory_space<vmem>>, %arg6: memref<8x128xf32, #tpu.memory_space<vmem>>) attributes {dimension_semantics = [#tpu.dimension_semantics<parallel>, #tpu.dimension_semantics<arbitrary>], iteration_bounds = array<i64: 1, 1>, scalar_prefetch = 0 : i64, scratch_operands = 1 : i64, tpu.core_type = #tpu.core_type<tc>, window_params = [{transform_indices = @transform_0, window_bounds = array<i64: 16, 128>}, {transform_indices = @transform_1, window_bounds = array<i64: 16, 128>}, {transform_indices = @transform_2, window_bounds = array<i64: 16, 128>}, {transform_indices = @transform_3, window_bounds = array<i64: 1, 1>}]} {
    %c0_i32 = arith.constant 0 : i32
    %0 = arith.cmpi eq, %arg1, %c0_i32 : i32
    %1 = arith.extui %0 : i1 to i32
    %c0_i32_0 = arith.constant 0 : i32
    %2 = arith.cmpi ne, %1, %c0_i32_0 : i32
    scf.if %2 {
      %cst_17 = arith.constant 0.000000e+00 : f32
      %38 = vector.broadcast %cst_17 : f32 to vector<8x128xf32>
      %c0_18 = arith.constant 0 : index
      %c0_19 = arith.constant 0 : index
      %39 = vector.load %arg6[%c0_18, %c0_19] : memref<8x128xf32, #tpu.memory_space<vmem>>, vector<8x128xf32>
      tpu.vector_store %arg6[%c0_18, %c0_19], %38 {strides = array<i32>} : memref<8x128xf32, #tpu.memory_space<vmem>>, vector<8x128xf32>,
    } else {
    }
    %c0 = arith.constant 0 : index
    %c0_1 = arith.constant 0 : index
    %3 = vector.load %arg2[%c0, %c0_1] : memref<16x128xf32, #tpu.memory_space<vmem>>, vector<16x128xf32>
    %c0_2 = arith.constant 0 : index
    %c0_3 = arith.constant 0 : index
    %4 = vector.load %arg3[%c0_2, %c0_3] : memref<16x128xf32, #tpu.memory_space<vmem>>, vector<16x128xf32>
    %c0_4 = arith.constant 0 : index
    %c0_5 = arith.constant 0 : index
    %5 = vector.load %arg4[%c0_4, %c0_5] : memref<16x128xf32, #tpu.memory_space<vmem>>, vector<16x128xf32>
    %6 = arith.negf %5 : vector<16x128xf32>
    %7 = math.exp %6 : vector<16x128xf32>
    %cst = arith.constant 1.000000e+00 : f32
    %8 = vector.broadcast %cst : f32 to vector<16x128xf32>
    %9 = arith.addf %8, %7 : vector<16x128xf32>
    %10 = arith.divf %8, %9 : vector<16x128xf32>
    %cst_6 = arith.constant 5.000000e-01 : f32
    %11 = vector.broadcast %cst_6 : f32 to vector<16x128xf32>
    %12 = arith.mulf %10, %11 : vector<16x128xf32>
    %cst_7 = arith.constant 5.000000e-01 : f32
    %13 = vector.broadcast %cst_7 : f32 to vector<16x128xf32>
    %14 = arith.addf %12, %13 : vector<16x128xf32>
    %15 = arith.subf %3, %4 : vector<16x128xf32>
    %16 = arith.mulf %14, %15 : vector<16x128xf32>
    %17 = arith.mulf %16, %15 : vector<16x128xf32>
    %c1_i32 = arith.constant 1 : i32
    %18 = arith.muli %arg0, %c1_i32 : i32
    %19 = arith.addi %18, %arg1 : i32
    %20 = tpu.iota {dimensions = array<i32: 0>} : vector<16x1xi32>
    %c16_i32 = arith.constant 16 : i32
    %21 = arith.muli %19, %c16_i32 : i32
    %22 = vector.broadcast %21 : i32 to vector<16x1xi32>
    %23 = arith.addi %20, %22 : vector<16x1xi32>
    %c16_i32_8 = arith.constant 16 : i32
    %24 = vector.broadcast %c16_i32_8 : i32 to vector<16x1xi32>
    %25 = arith.cmpi slt, %23, %24 : vector<16x1xi32>
    %cst_9 = arith.constant 0.000000e+00 : f32
    %26 = vector.shape_cast %25 : vector<16x1xi1> to vector<16x1xi1>
    %27 = vector.broadcast %26 : vector<16x1xi1> to vector<16x128xi1>
    %28 = vector.broadcast %cst_9 : f32 to vector<16x128xf32>
    %29 = arith.select %27, %17, %28 : vector<16x128xi1>, vector<16x128xf32>
    %c0_10 = arith.constant 0 : index
    %c0_11 = arith.constant 0 : index
    %30 = vector.load %arg6[%c0_10, %c0_11] : memref<8x128xf32, #tpu.memory_space<vmem>>, vector<8x128xf32>
    %31 = vector.shape_cast %29 : vector<16x128xf32> to vector<2x8x128xf32>
    %cst_12 = arith.constant dense<0.000000e+00> : vector<8x128xf32>
    %32 = vector.multi_reduction <add>, %31, %cst_12 [0] : vector<2x8x128xf32> to vector<8x128xf32>
    %33 = arith.addf %30, %32 : vector<8x128xf32>
    %c0_13 = arith.constant 0 : index
    %c0_14 = arith.constant 0 : index
    %34 = vector.load %arg6[%c0_13, %c0_14] : memref<8x128xf32, #tpu.memory_space<vmem>>, vector<8x128xf32>
    tpu.vector_store %arg6[%c0_13, %c0_14], %33 {strides = array<i32>} : memref<8x128xf32, #tpu.memory_space<vmem>>, vector<8x128xf32>,
    %c0_i32_15 = arith.constant 0 : i32
    %35 = arith.cmpi eq, %arg1, %c0_i32_15 : i32
    %36 = arith.extui %35 : i1 to i32
    %c0_i32_16 = arith.constant 0 : i32
    %37 = arith.cmpi ne, %36, %c0_i32_16 : i32
    scf.if %37 {
      %c0_17 = arith.constant 0 : index
      %c0_18 = arith.constant 0 : index
      %38 = vector.load %arg6[%c0_17, %c0_18] : memref<8x128xf32, #tpu.memory_space<vmem>>, vector<8x128xf32>
      %39 = vector.shape_cast %38 : vector<8x128xf32> to vector<1x8x128xf32>
      %cst_19 = arith.constant dense<0.000000e+00> : vector<1xf32>
      %40 = vector.multi_reduction <add>, %39, %cst_19 [1, 2] : vector<1x8x128xf32> to vector<1xf32>
      %41 = vector.shape_cast %40 : vector<1xf32> to vector<1x1x1xf32>
      %42 = vector.extract %41[0, 0, 0] : f32 from vector<1x1x1xf32>
      %43 = vector.broadcast %42 : f32 to vector<1x1xf32>
      %c0_20 = arith.constant 0 : index
      %c0_21 = arith.constant 0 : index
      %44 = vector.load %arg5[%c0_20, %c0_21] : memref<1x1xf32, #tpu.memory_space<vmem>>, vector<1x1xf32>
      tpu.vector_store %arg5[%c0_20, %c0_21], %43 {strides = array<i32>} : memref<1x1xf32, #tpu.memory_space<vmem>>, vector<1x1xf32>,
    } else {
    }
    return
  }
  func.func @transform_0(%arg0: i32, %arg1: i32) -> (i32, i32) {
    %c1_i32 = arith.constant 1 : i32
    %0 = arith.muli %arg0, %c1_i32 : i32
    %1 = arith.addi %0, %arg1 : i32
    %c0_i32 = arith.constant 0 : i32
    %2 = arith.minsi %1, %c0_i32 : i32
    %c0_i32_0 = arith.constant 0 : i32
    %c0_i32_1 = arith.constant 0 : i32
    return %2, %c0_i32_0 : i32, i32
  }
  func.func @transform_1(%arg0: i32, %arg1: i32) -> (i32, i32) {
    %c1_i32 = arith.constant 1 : i32
    %0 = arith.muli %arg0, %c1_i32 : i32
    %1 = arith.addi %0, %arg1 : i32
    %c0_i32 = arith.constant 0 : i32
    %2 = arith.minsi %1, %c0_i32 : i32
    %c0_i32_0 = arith.constant 0 : i32
    %c0_i32_1 = arith.constant 0 : i32
    return %2, %c0_i32_0 : i32, i32
  }
  func.func @transform_2(%arg0: i32, %arg1: i32) -> (i32, i32) {
    %c1_i32 = arith.constant 1 : i32
    %0 = arith.muli %arg0, %c1_i32 : i32
    %1 = arith.addi %0, %arg1 : i32
    %c0_i32 = arith.constant 0 : i32
    %2 = arith.minsi %1, %c0_i32 : i32
    %c0_i32_0 = arith.constant 0 : i32
    %c0_i32_1 = arith.constant 0 : i32
    return %2, %c0_i32_0 : i32, i32
  }
  func.func @transform_3(%arg0: i32, %arg1: i32) -> (i32, i32) {
    %c0_i32 = arith.constant 0 : i32
    %c0_i32_0 = arith.constant 0 : i32
    return %arg0, %c0_i32 : i32, i32
  }
}

</mosaic_0001>

<bundles_post_ra>
// kernel: tpu_custom_call.1
= control target key start
LH: loop header
LB: loop body
LE: loop exit
PB: predicated region body
PF: predicated region fallthrough
CT: control target
= control target key end

     0   :  { %8 = vsyncpa [#allocation4], 0  ;;  %s319_s0 = inlined_call_operand.hbm [shape: f32[16,128], index: 0, kind: input, shape index: {}]   ;;  %s320_s1 = inlined_call_operand.hbm [shape: f32[16,128], index: 1, kind: input, shape index: {}]   ;;  %s321_s2 = inlined_call_operand.hbm [shape: f32[16,128], index: 2, kind: input, shape index: {}]   ;;  %s322_s3 = inlined_call_operand.hbm [shape: f32[1,1], index: 3, kind: output, shape index: {}]  }
   0x1   :  { %9 = vsyncpa [#allocation7], 0 }
   0x2   :  { %10 = vsyncpa [#allocation5], 0  ;;  %s281_s12 = smov [#allocation6]   ;;  %s282_s14 = smov [#allocation3]  }
   0x3   :  { %s40_s13 = sshll.u32 %s281_s12, 4  ;;  %s22_s15 = sshll.u32 %s282_s14, 4  ;;  %s41_s13 = int_to_ptr.vmem [resolvable:$true] %s40_s13  ;;  %s23_s15 = int_to_ptr.vmem [resolvable:$true] %s22_s15 }
   0x4   :  { %s203_s16 = scalar_lea.vmem %s41_s13, 256  ;;  %p208_p1 = scmp.lt.s32.totalorder %s41_s13, %s41_s13 }
   0x5   :  { %p204_p0 = scmp.ne.s32.totalorder %s41_s13, %s203_s16  ;;  %p209_p2 = scmp.lt.s32.totalorder %s203_s16, %s203_s16 }
   0x7   :  { %p210_p3 = por %p209_p2, %p208_p1 }
   0x9   :  { %p211_p4 = pnand %p210_p3, %p204_p0 }
   0xb   :  { %214 = shalt.err (!%p211_p4)
}
   0xc   :  { %s283_s17 = smov 128   ;;  %s284_s18 = smov 8  }
   0xd   :  { %46 = dma.hbm_to_vmem [thread:$0]  %s320_s1, 256, %s41_s13, [#allocation7], %s283_s17, %s283_s17, %s284_s18  }
   0xe   :  { %s223_s21 = scalar_lea.vmem %s23_s15, 256  ;;  %p228_p6 = scmp.lt.s32.totalorder %s23_s15, %s23_s15 }
   0xf   :  { %p224_p5 = scmp.ne.s32.totalorder %s23_s15, %s223_s21  ;;  %p229_p7 = scmp.lt.s32.totalorder %s223_s21, %s223_s21 }
  0x11   :  { %p230_p8 = por %p229_p7, %p228_p6 }
  0x13   :  { %p231_p9 = pnand %p230_p8, %p224_p5 }
  0x15   :  { %234 = shalt.err (!%p231_p9)
}
  0x16   :  { %28 = dma.hbm_to_vmem [thread:$0]  %s319_s0, 256, %s23_s15, [#allocation4], %s283_s17, %s283_s17, %s284_s18  }
  0x17   :  { %s285_s24 = smov [#allocation8]  }
  0x18   :  { %s58_s25 = sshll.u32 %s285_s24, 4  ;;  %s59_s25 = int_to_ptr.vmem [resolvable:$true] %s58_s25 }
  0x19   :  { %s243_s26 = scalar_lea.vmem %s59_s25, 256  ;;  %p248_p11 = scmp.lt.s32.totalorder %s59_s25, %s59_s25 }
  0x1a   :  { %p244_p10 = scmp.ne.s32.totalorder %s59_s25, %s243_s26  ;;  %p249_p12 = scmp.lt.s32.totalorder %s243_s26, %s243_s26 }
  0x1c   :  { %p250_p13 = por %p249_p12, %p248_p11 }
  0x1e   :  { %p251_p0 = pnand %p250_p13, %p244_p10 }
  0x20   :  { %254 = shalt.err (!%p251_p0)
}
  0x21   :  { %64 = dma.hbm_to_vmem [thread:$0]  %s321_s2, 256, %s59_s25, [#allocation7], %s283_s17, %s283_s17, %s284_s18  }
  0x22   :  { %275 = dma.done.wait [#allocation4], 256  }
  0x23   :  { %276 = vsyncadd [#allocation4], 4294967040 }
  0x24   :  { %277 = dma.done.wait [#allocation7], 512  }
  0x25   :  { %278 = vsyncadd [#allocation7], 4294966784  ;;  %v95_v0 = vld [vmem:[#allocation8] sm:$0xff]  ;;  %v96_v1 = vld [vmem:[#allocation8 + $0x8] sm:$0xff]  ;;  %s286_s0 = smov [#allocation9]   ;;  %vm153_vm0 = vcmask 0  }
  0x26   :  { %v177_v2 = vmul.f32 -1.442695, %v95_v0  ;;  %v178_v3 = vmul.f32 -1.442695, %v96_v1  ;;  %v91_v8 = vld [vmem:[#allocation3] sm:$0xff]  ;;  %v93_v9 = vld [vmem:[#allocation6] sm:$0xff] }
  0x27   :  { %v92_v10 = vld [vmem:[#allocation3 + $0x8] sm:$0xff]  ;;  %v94_v11 = vld [vmem:[#allocation6 + $0x8] sm:$0xff]  ;;  %v113_v15 = vsub.f32 %v91_v8, %v93_v9  ;;  %s161_s2 = sshll.u32 %s286_s0, 4  ;;  %s162_s2 = int_to_ptr.vmem [resolvable:$true] %s161_s2 }
  0x28   :  { %187 = vpow2.f32 %v177_v2  ;;  %v114_v17 = vsub.f32 %v92_v10, %v94_v11  ;;  %s255_s29 = scalar_lea.vmem %s162_s2, 16  ;;  %s259_s30 = scalar_lea.vmem %s162_s2, 32 }
  0x29   :  { %189 = vpow2.f32 %v178_v3  ;;  %p256_p1 = scmp.ne.s32.totalorder %s162_s2, %s255_s29  ;;  %p260_p2 = scmp.lt.s32.totalorder %s162_s2, %s162_s2 }
  0x2a   :  { %p261_p3 = scmp.lt.s32.totalorder %s259_s30, %s255_s29 }
  0x2c   :  { %p262_p4 = por %p261_p3, %p260_p2 }
  0x2e   :  { %p263_p5 = pnand %p262_p4, %p256_p1 }
  0x35   :  { %v188_v4 = vpop.eup %187 }
  0x36   :  { %v190_v5 = vpop.eup %189  ;;  %v103_v6 = vadd.f32 1.0, %v188_v4 }
  0x37   :  { %v104_v7 = vadd.f32 1.0, %v190_v5 }
  0x38   :  { %191 = vrcp.f32 %v103_v6 }
  0x39   :  { %193 = vrcp.f32 %v104_v7 }
  0x45   :  { %v192_v12 = vpop.eup %191 }
  0x46   :  { %v194_v13 = vpop.eup %193  ;;  %v109_v14 = vmul.f32 0.5, %v192_v12 }
  0x47   :  { %v110_v16 = vmul.f32 0.5, %v194_v13 }
  0x48   :  { %v111_v18 = vadd.f32 0.5, %v109_v14 }
  0x49   :  { %v112_v19 = vadd.f32 0.5, %v110_v16 }
  0x4a   :  { %v115_v20 = vmul.f32 %v113_v15, %v111_v18 }
  0x4b   :  { %v116_v21 = vmul.f32 %v114_v17, %v112_v19 }
  0x4c   :  { %v117_v22 = vmul.f32 %v115_v20, %v113_v15 }
  0x4d   :  { %v118_v23 = vmul.f32 %v116_v21, %v114_v17 }
  0x4f   :  { %v136_v24 = vadd.f32 %v118_v23, %v117_v22 }
  0x51   :  { %143 = vadd.xlane.f32.xlu0 %v136_v24 }
  0xda   :  { %v144_v25 = vpop.xlane.xlu0 %143 }
  0xdb   :  { %v145_v26 = vrot.slane %v144_v25, 4 }
  0xdd   :  { %v146_v27 = vadd.f32 %v145_v26, %v144_v25 }
  0xdf   :  { %v147_v28 = vrot.slane %v146_v27, 2 }
  0xe1   :  { %v148_v29 = vadd.f32 %v147_v28, %v146_v27 }
  0xe3   :  { %v149_v30 = vrot.slane %v148_v29, 1 }
  0xe5   :  { %v150_v31 = vadd.f32 %v149_v30, %v148_v29 }
  0xe7   :  { %179 = vpush %v150_v31 }
 0x118   :  { %s180_s28 = spop %179 }
 0x119   :  { %v152_v32 = vstv %s180_s28 }
 0x11a   :  { %154 = vst.msk [vmem:[#allocation9] sm:$0x1] %vm153_vm0, %v152_v32 }
 0x11b   :  { %266 = shalt.err (!%p263_p5)
}
 0x11c   :  { %164 = dma.vmem_to_hbm [thread:$0]  %s162_s2, 16, %s322_s3, [#allocation5]  }
 0x11d   :  { %279 = dma.done.wait [#allocation5], 16  }
 0x11e   :  { %280 = vsyncadd [#allocation5], 4294967280 }
 0x11f   :  { %168 = vsyncpa [#allocation4], 1 }
 0x120   :  { %169 = vsyncpa [#allocation7], 1 }
 0x121   :  { %170 = vsyncpa [#allocation5], 1 }

</bundles_post_ra>
